<compile_context>
chip_gen: v6e
topology: v6e:2x2x1
jax: 0.10.0
libtpu: 0.0.40
codegen_flags: <defaults>
</compile_context>

<pallas_src>
import math

import jax
import jax.numpy as jnp
from jax import lax
from jax.experimental import pallas as pl
from jax.experimental.pallas import tpu as pltpu


def _round_up(x, m):
    return ((x + m - 1) // m) * m


def _noisy_linear_kernel(x_ref, mu_w_ref, sig_w_ref, eps_w_ref,
                         mu_b_ref, sig_b_ref, eps_b_ref, o_ref, acc_ref):
    k = pl.program_id(2)

    @pl.when(k == 0)
    def _():
        acc_ref[...] = jnp.zeros_like(acc_ref)

    # Noisy weight tile, built on the VPU. Shape (tn, tk) == (out, in) layout.
    w = mu_w_ref[...] + sig_w_ref[...] * eps_w_ref[...]

    # acc += x_tile @ w_tile.T, expressed as a dot_general that contracts the
    # last dim of both operands -> MXU consumes w directly, no XLU transpose.
    acc_ref[...] += lax.dot_general(
        x_ref[...], w,
        dimension_numbers=(((1,), (1,)), ((), ())),
        preferred_element_type=jnp.float32)

    @pl.when(k == pl.num_programs(2) - 1)
    def _():
        b = mu_b_ref[...] + sig_b_ref[...] * eps_b_ref[...]        # (1, tn)
        o_ref[...] = (acc_ref[...] + b).astype(o_ref.dtype)


def noisy_linear(x, mu_w, sig_w, eps_w, mu_b, sig_b, eps_b,
                 *, tm=128, tn=256, tk=512):
    """x: (B, num_in) f32; weights PyTorch-style (num_out, num_in).

    Returns y: (B, num_out) f32 == x @ (mu_w + sig_w*eps_w).T + (mu_b + sig_b*eps_b).
    """
    B, num_in = x.shape
    num_out = mu_w.shape[0]

    # Clamp tile sizes to the (8,128)-aligned problem size.
    Mp = _round_up(B, 8)
    Np = _round_up(num_out, 128)
    Kp = _round_up(num_in, 128)
    tm = min(tm, Mp)
    tn = min(tn, Np)
    tk = min(tk, Kp)
    Mp = _round_up(Mp, tm)
    Np = _round_up(Np, tn)
    Kp = _round_up(Kp, tk)

    # Zero-pad to tile multiples. Padded K columns of x are zero and padded N
    # rows produce zeros; both are harmless and the result is sliced back.
    def pad2(a, r, c):
        return jnp.pad(a, ((0, r - a.shape[0]), (0, c - a.shape[1])))

    xp = pad2(x, Mp, Kp)
    mu_wp = pad2(mu_w, Np, Kp)
    sig_wp = pad2(sig_w, Np, Kp)
    eps_wp = pad2(eps_w, Np, Kp)
    mu_bp = pad2(mu_b.reshape(1, num_out), 1, Np)
    sig_bp = pad2(sig_b.reshape(1, num_out), 1, Np)
    eps_bp = pad2(eps_b.reshape(1, num_out), 1, Np)

    grid = (Mp // tm, Np // tn, Kp // tk)

    out = pl.pallas_call(
        _noisy_linear_kernel,
        out_shape=jax.ShapeDtypeStruct((Mp, Np), jnp.float32),
        grid_spec=pltpu.PrefetchScalarGridSpec(
            num_scalar_prefetch=0,
            grid=grid,
            in_specs=[
                pl.BlockSpec((tm, tk), lambda i, j, k: (i, k)),   # x
                pl.BlockSpec((tn, tk), lambda i, j, k: (j, k)),   # mu_w
                pl.BlockSpec((tn, tk), lambda i, j, k: (j, k)),   # sigma_w
                pl.BlockSpec((tn, tk), lambda i, j, k: (j, k)),   # eps_w
                pl.BlockSpec((1, tn), lambda i, j, k: (0, j)),    # mu_b
                pl.BlockSpec((1, tn), lambda i, j, k: (0, j)),    # sigma_b
                pl.BlockSpec((1, tn), lambda i, j, k: (0, j)),    # eps_b
            ],
            out_specs=pl.BlockSpec((tm, tn), lambda i, j, k: (i, j)),
            scratch_shapes=[pltpu.VMEM((tm, tn), jnp.float32)],
        ),
        compiler_params=pltpu.CompilerParams(
            dimension_semantics=("parallel", "parallel", "arbitrary")),
    )(xp, mu_wp, sig_wp, eps_wp, mu_bp, sig_bp, eps_bp)

    return out[:B, :num_out]


def init_params(key, num_in, num_out):
    """Deterministic re-implementation of NoisyLinear.reset_parameters()."""
    std = math.sqrt(3.0 / num_in)
    k_w, k_b = jax.random.split(key)
    mu_w = jax.random.uniform(k_w, (num_out, num_in), jnp.float32, -std, std)
    mu_b = jax.random.uniform(k_b, (num_out,), jnp.float32, -std, std)
    sig_w = jnp.full((num_out, num_in), 0.017, jnp.float32)
    sig_b = jnp.full((num_out,), 0.017, jnp.float32)
    return mu_w, mu_b, sig_w, sig_b


def sample_noise(key, num_in, num_out):
    """Re-implementation of reset_noise(): standard-normal epsilon buffers."""
    k_w, k_b = jax.random.split(key)
    eps_w = jax.random.normal(k_w, (num_out, num_in), jnp.float32)
    eps_b = jax.random.normal(k_b, (num_out,), jnp.float32)
    return eps_w, eps_b


if __name__ == "__main__":
    # Small but non-trivial: exercises padding (192 -> 256, 320 -> 384) and a
    # multi-step grid (1 x 2 x 3) with the given demo tile sizes.
    num_in, num_out, batch = 320, 192, 8

    root = jax.random.PRNGKey(0)
    k_param, k_noise, k_x = jax.random.split(root, 3)

    mu_w, mu_b, sig_w, sig_b = init_params(k_param, num_in, num_out)
    # forward() calls reset_noise() at the start of every call; we sample the
    # per-call noise here (deterministically) and feed it to the kernel.
    eps_w, eps_b = sample_noise(k_noise, num_in, num_out)

    x = jax.random.normal(k_x, (batch, num_in), jnp.float32)

    y = noisy_linear(x, mu_w, sig_w, eps_w, mu_b, sig_b, eps_b,
                     tm=128, tn=128, tk=128)
    y = jax.block_until_ready(y)

    # Pure-JAX reference (is_training=True branch of forward()).
    w_ref = mu_w + sig_w * eps_w
    b_ref = mu_b + sig_b * eps_b
    y_ref = jnp.dot(x, w_ref.T, precision=lax.Precision.HIGHEST) + b_ref

    assert y.shape == (batch, num_out)
    assert jnp.allclose(y, y_ref, atol=1e-4, rtol=1e-4), "mismatch vs reference"

    print("KERNEL_OK")
</pallas_src>

<mosaic_0001>
module attributes {stable_mosaic.version = 11 : i64} {
  func.func @_noisy_linear_kernel(%arg0: i32, %arg1: i32, %arg2: i32, %arg3: memref<8x128xf32, #tpu.memory_space<vmem>>, %arg4: memref<128x128xf32, #tpu.memory_space<vmem>>, %arg5: memref<128x128xf32, #tpu.memory_space<vmem>>, %arg6: memref<128x128xf32, #tpu.memory_space<vmem>>, %arg7: memref<1x128xf32, #tpu.memory_space<vmem>>, %arg8: memref<1x128xf32, #tpu.memory_space<vmem>>, %arg9: memref<1x128xf32, #tpu.memory_space<vmem>>, %arg10: memref<8x128xf32, #tpu.memory_space<vmem>>, %arg11: memref<8x128xf32, #tpu.memory_space<vmem>>) attributes {dimension_semantics = [#tpu.dimension_semantics<parallel>, #tpu.dimension_semantics<parallel>, #tpu.dimension_semantics<arbitrary>], iteration_bounds = array<i64: 1, 2, 3>, scalar_prefetch = 0 : i64, scratch_operands = 1 : i64, tpu.core_type = #tpu.core_type<tc>, window_params = [{transform_indices = @transform_0, window_bounds = array<i64: 8, 128>}, {transform_indices = @transform_1, window_bounds = array<i64: 128, 128>}, {transform_indices = @transform_2, window_bounds = array<i64: 128, 128>}, {transform_indices = @transform_3, window_bounds = array<i64: 128, 128>}, {transform_indices = @transform_4, window_bounds = array<i64: 1, 128>}, {transform_indices = @transform_5, window_bounds = array<i64: 1, 128>}, {transform_indices = @transform_6, window_bounds = array<i64: 1, 128>}, {transform_indices = @transform_7, window_bounds = array<i64: 8, 128>}]} {
    %c0_i32 = arith.constant 0 : i32
    %0 = arith.cmpi eq, %arg2, %c0_i32 : i32
    %1 = arith.extui %0 : i1 to i32
    %c0_i32_0 = arith.constant 0 : i32
    %2 = arith.cmpi ne, %1, %c0_i32_0 : i32
    scf.if %2 {
      %cst_13 = arith.constant 0.000000e+00 : f32
      %16 = vector.broadcast %cst_13 : f32 to vector<8x128xf32>
      %c0_14 = arith.constant 0 : index
      %c0_15 = arith.constant 0 : index
      %17 = vector.load %arg11[%c0_14, %c0_15] : memref<8x128xf32, #tpu.memory_space<vmem>>, vector<8x128xf32>
      tpu.vector_store %arg11[%c0_14, %c0_15], %16 {strides = array<i32>} : memref<8x128xf32, #tpu.memory_space<vmem>>, vector<8x128xf32>,
    } else {
    }
    %c0 = arith.constant 0 : index
    %c0_1 = arith.constant 0 : index
    %3 = vector.load %arg4[%c0, %c0_1] : memref<128x128xf32, #tpu.memory_space<vmem>>, vector<128x128xf32>
    %c0_2 = arith.constant 0 : index
    %c0_3 = arith.constant 0 : index
    %4 = vector.load %arg5[%c0_2, %c0_3] : memref<128x128xf32, #tpu.memory_space<vmem>>, vector<128x128xf32>
    %c0_4 = arith.constant 0 : index
    %c0_5 = arith.constant 0 : index
    %5 = vector.load %arg6[%c0_4, %c0_5] : memref<128x128xf32, #tpu.memory_space<vmem>>, vector<128x128xf32>
    %6 = arith.mulf %4, %5 : vector<128x128xf32>
    %7 = arith.addf %3, %6 : vector<128x128xf32>
    %c0_6 = arith.constant 0 : index
    %c0_7 = arith.constant 0 : index
    %8 = vector.load %arg11[%c0_6, %c0_7] : memref<8x128xf32, #tpu.memory_space<vmem>>, vector<8x128xf32>
    %c0_8 = arith.constant 0 : index
    %c0_9 = arith.constant 0 : index
    %9 = vector.load %arg3[%c0_8, %c0_9] : memref<8x128xf32, #tpu.memory_space<vmem>>, vector<8x128xf32>
    %cst = arith.constant dense<0.000000e+00> : vector<8x128xf32>
    %10 = tpu.matmul %9, %7, %cst {dimension_numbers = #tpu.dot_dimension_numbers<[1], [1], [0], [0], [0, 0, 1, 0], [], []>} : vector<8x128xf32>, vector<128x128xf32>, vector<8x128xf32> -> vector<8x128xf32>
    %11 = arith.addf %8, %10 : vector<8x128xf32>
    %c0_10 = arith.constant 0 : index
    %c0_11 = arith.constant 0 : index
    %12 = vector.load %arg11[%c0_10, %c0_11] : memref<8x128xf32, #tpu.memory_space<vmem>>, vector<8x128xf32>
    tpu.vector_store %arg11[%c0_10, %c0_11], %11 {strides = array<i32>} : memref<8x128xf32, #tpu.memory_space<vmem>>, vector<8x128xf32>,
    %c2_i32 = arith.constant 2 : i32
    %13 = arith.cmpi eq, %arg2, %c2_i32 : i32
    %14 = arith.extui %13 : i1 to i32
    %c0_i32_12 = arith.constant 0 : i32
    %15 = arith.cmpi ne, %14, %c0_i32_12 : i32
    scf.if %15 {
      %c0_13 = arith.constant 0 : index
      %c0_14 = arith.constant 0 : index
      %16 = vector.load %arg7[%c0_13, %c0_14] : memref<1x128xf32, #tpu.memory_space<vmem>>, vector<1x128xf32>
      %c0_15 = arith.constant 0 : index
      %c0_16 = arith.constant 0 : index
      %17 = vector.load %arg8[%c0_15, %c0_16] : memref<1x128xf32, #tpu.memory_space<vmem>>, vector<1x128xf32>
      %c0_17 = arith.constant 0 : index
      %c0_18 = arith.constant 0 : index
      %18 = vector.load %arg9[%c0_17, %c0_18] : memref<1x128xf32, #tpu.memory_space<vmem>>, vector<1x128xf32>
      %19 = arith.mulf %17, %18 : vector<1x128xf32>
      %20 = arith.addf %16, %19 : vector<1x128xf32>
      %c0_19 = arith.constant 0 : index
      %c0_20 = arith.constant 0 : index
      %21 = vector.load %arg11[%c0_19, %c0_20] : memref<8x128xf32, #tpu.memory_space<vmem>>, vector<8x128xf32>
      %22 = vector.broadcast %20 : vector<1x128xf32> to vector<8x128xf32>
      %23 = arith.addf %21, %22 : vector<8x128xf32>
      %c0_21 = arith.constant 0 : index
      %c0_22 = arith.constant 0 : index
      %24 = vector.load %arg10[%c0_21, %c0_22] : memref<8x128xf32, #tpu.memory_space<vmem>>, vector<8x128xf32>
      tpu.vector_store %arg10[%c0_21, %c0_22], %23 {strides = array<i32>} : memref<8x128xf32, #tpu.memory_space<vmem>>, vector<8x128xf32>,
    } else {
    }
    return
  }
  func.func @transform_0(%arg0: i32, %arg1: i32, %arg2: i32) -> (i32, i32) {
    %c0_i32 = arith.constant 0 : i32
    return %arg0, %arg2 : i32, i32
  }
  func.func @transform_1(%arg0: i32, %arg1: i32, %arg2: i32) -> (i32, i32) {
    %c0_i32 = arith.constant 0 : i32
    return %arg1, %arg2 : i32, i32
  }
  func.func @transform_2(%arg0: i32, %arg1: i32, %arg2: i32) -> (i32, i32) {
    %c0_i32 = arith.constant 0 : i32
    return %arg1, %arg2 : i32, i32
  }
  func.func @transform_3(%arg0: i32, %arg1: i32, %arg2: i32) -> (i32, i32) {
    %c0_i32 = arith.constant 0 : i32
    return %arg1, %arg2 : i32, i32
  }
  func.func @transform_4(%arg0: i32, %arg1: i32, %arg2: i32) -> (i32, i32) {
    %c0_i32 = arith.constant 0 : i32
    %c0_i32_0 = arith.constant 0 : i32
    return %c0_i32, %arg1 : i32, i32
  }
  func.func @transform_5(%arg0: i32, %arg1: i32, %arg2: i32) -> (i32, i32) {
    %c0_i32 = arith.constant 0 : i32
    %c0_i32_0 = arith.constant 0 : i32
    return %c0_i32, %arg1 : i32, i32
  }
  func.func @transform_6(%arg0: i32, %arg1: i32, %arg2: i32) -> (i32, i32) {
    %c0_i32 = arith.constant 0 : i32
    %c0_i32_0 = arith.constant 0 : i32
    return %c0_i32, %arg1 : i32, i32
  }
  func.func @transform_7(%arg0: i32, %arg1: i32, %arg2: i32) -> (i32, i32) {
    %c0_i32 = arith.constant 0 : i32
    return %arg0, %arg1 : i32, i32
  }
}

</mosaic_0001>

<bundles_post_ra>
// kernel: tpu_custom_call.1
= control target key start
LH: loop header
LB: loop body
LE: loop exit
PB: predicated region body
PF: predicated region fallthrough
CT: control target
= control target key end

     0   :  { %s1862_s0 = inlined_call_operand.hbm [shape: f32[8,384], index: 0, kind: input, shape index: {}]   ;;  %s1863_s1 = inlined_call_operand.hbm [shape: f32[256,384], index: 1, kind: input, shape index: {}]   ;;  %s1864_s2 = inlined_call_operand.hbm [shape: f32[256,384], index: 2, kind: input, shape index: {}]   ;;  %s1865_s3 = inlined_call_operand.hbm [shape: f32[256,384], index: 3, kind: input, shape index: {}]   ;;  %s1866_s4 = inlined_call_operand.vmem [shape: f32[1,256], index: 4, kind: input, shape index: {}]   ;;  %s1867_s5 = inlined_call_operand.vmem [shape: f32[1,256], index: 5, kind: input, shape index: {}]   ;;  %s1868_s6 = inlined_call_operand.vmem [shape: f32[1,256], index: 6, kind: input, shape index: {}]   ;;  %s1869_s7 = inlined_call_operand.hbm [shape: f32[8,256], index: 7, kind: output, shape index: {}]  }
   0x1   :  { %1891 = sst [smem:[#allocation30_spill]] %s1862_s0 }
   0x2   :  { %1892 = sst [smem:[#allocation31_spill]] %s1863_s1 }
   0x3   :  { %1893 = sst [smem:[#allocation32_spill]] %s1866_s4 }
   0x4   :  { %1894 = sst [smem:[#allocation33_spill]] %s1867_s5 }
   0x5   :  { %1895 = sst [smem:[#allocation34_spill]] %s1868_s6 }
   0x6   :  { %1896 = sst [smem:[#allocation35_spill]] %s1869_s7 }
   0x7   :  { %12 = vsyncpa [#allocation4], 0 }
   0x8   :  { %14 = vsyncpa [#allocation4 + $0x1], 0 }
   0x9   :  { %15 = vsyncpa [#allocation7], 0 }
   0xa   :  { %17 = vsyncpa [#allocation7 + $0x1], 0 }
   0xb   :  { %18 = vsyncpa [#allocation10], 0 }
   0xc   :  { %20 = vsyncpa [#allocation10 + $0x1], 0 }
   0xd   :  { %21 = vsyncpa [#allocation5], 0 }
   0xe   :  { %23 = vsyncpa [#allocation5 + $0x1], 0  ;;  %s1422_s24 = smov 0   ;;  %s1424_s25 = smov 0  }
   0xf   :  { %s1426_s26 = smov 0   ;;  %s1428_s27 = smov 0  }
  0x10   :  { %s1430_s28 = smov 0   ;;  %s1432_s29 = smov 0  }
  0x11   :  { %s1434_s30 = smov 0   ;;  %s1436_s8 = smov 0  }
  0x12   :  { %s1438_s9 = smov 0   ;;  %s1440_s10 = smov 0  }
  0x13   :  { %s1442_s11 = smov 0   ;;  %s1444_s12 = smov 0  }
  0x14   :  { %s1446_s13 = smov 0   ;;  %s1448_s14 = smov 0  }
  0x15 LB: > { %1897 = sst [smem:[#allocation16_spill]] %s1325_s26  ;;  %p65_p0 = scmp.eq.s32.totalorder %s1369_s14, 0  ;;  %s1369_s14 = sphi %s1448_s14, %s29_s14   ;;  %s1365_s13 = sphi %s1446_s13, %s1955_s13   ;;  %s1361_s12 = sphi %s1444_s12, %s1963_s12   ;;  %s1357_s11 = sphi %s1442_s11, %s1953_s11   ;;  %s1353_s10 = sphi %s1440_s10, %s1952_s10   ;;  %s1349_s9 = sphi %s1438_s9, %s1951_s9   ;;  %s1345_s8 = sphi %s1436_s8, %s1962_s8   ;;  %s1341_s30 = sphi %s1434_s30, %s1961_s30   ;;  %s1337_s29 = sphi %s1432_s29, %s1960_s29   ;;  %s1333_s28 = sphi %s1430_s28, %s1959_s28   ;;  %s1329_s27 = sphi %s1428_s27, %s1948_s27   ;;  %s1325_s26 = sphi %s1426_s26, %s1947_s26   ;;  %s1321_s25 = sphi %s1424_s25, %s1958_s25   ;;  %s1317_s24 = sphi %s1422_s24, %s1957_s24  }
  0x16   : > { %1898 = sst [smem:[#allocation17_spill]] %s1333_s28  ;;  %p92_p1 = scmp.ne.s32.totalorder %s1337_s29, %s1333_s28 }
  0x17   : > { %1899 = sst [smem:[#allocation18_spill]] %s1349_s9  ;;  %p985_p2 = scmp.lt.s32.totalorder %s1369_s14, 6 }
  0x18   : > { %1900 = sst [smem:[#allocation19_spill]] %s1353_s10  ;;  %p94_p3 = por %p92_p1, %p65_p0 }
  0x19   : > { %1901 = sst [smem:[#allocation20_spill]] %s1357_s11  ;;  %s304_s17 = sand.u32 1, %s1369_s14  }
  0x1a   : > { %1902 = sst [smem:[#allocation21_spill]] %s1361_s12  ;;  %s1871_s18 = sand.u32 1, %s1337_s29  }
  0x1b   : > { %1903 = sst [smem:[#allocation22_spill]] %s1365_s13  ;;  %s1504_s19 = sshll.u32 %s1871_s18, 7 }
  0x1c   : > { %s955_s20 = smul.u32 48, %s1365_s13  ;;  %p1509_p4 = pnand %p985_p2, %p94_p3 }
  0x1d   : > { %s308_s23 = scalar_lea.vmem [#allocation6], %s1504_s19  ;;  %s1905_s1 = sld [smem:[#allocation31_spill]] }
  0x1e   : > { %s314_s22 = sadd.s32 %s1361_s12, %s955_s20  ;;  %s317_s16 = sshll.u32 %s308_s23, 4  ;;  %s318_s16 = int_to_ptr.vmem [resolvable:$true] %s317_s16 }
  0x1f   : > { %s1515_s15 = sshll.u32 %s314_s22, 7  ;;  %p891_p5 = scmp.ge.s32.totalorder %s1369_s14, 1 }
  0x20   : > { %s1522_s6 = scalar_lea.sflag [#allocation7], %s304_s17  ;;  %p1883_p6 = pneg %p1509_p4 }
  0x21   : > { %s1118_s5 = scalar_lea.vmem %s318_s16, 2048  ;;  %s1371_s20 = smov [#allocation6]  }
  0x22   : > { %p1119_p7 = scmp.ne.s32.totalorder %s318_s16, %s1118_s5  ;;  %s1123_s22 = sshll.u32 %s1371_s20, 4  ;;  %s1124_s22 = int_to_ptr.vmem [resolvable:$false] %s1123_s22 }
  0x23   : > { %s316_s18 = scalar_lea.hbm %s1905_s1, %s1515_s15  ;;  %s1125_s23 = scalar_lea.vmem %s1124_s22, 4096 }
  0x24   : > { %p1121_p8 = pnand %p1119_p7, %p1883_p6  ;;  %p1126_p10 = scmp.lt.s32.totalorder %s318_s16, %s1124_s22 }
  0x25   : > { %p1127_p11 = scmp.lt.s32.totalorder %s1125_s23, %s1118_s5 }
  0x26   : > { %p1122_p9 = pneg %p1121_p8 }
  0x27   : > { %p1128_p12 = por %p1127_p11, %p1126_p10 }
  0x29   : > { %p1129_p13 = pnand %p1128_p12, %p1122_p9 }
  0x2b   : > { %1132 = shalt.err (!%p1129_p13)
}
  0x2c   : > { %s1872_s7 = smov 384   ;;  %s1874_s5 = smov 128  }
  0x2d   : > { %s1876_s10 = smov 8   ;;  %p389_p1 = scmp.lt.s32.totalorder %s1369_s14, 7 }
  0x2e   : > { %974 = dma.hbm_to_vmem [thread:$0]  (!%p1509_p4), %s316_s18, 2048, %s318_s16, %s1522_s6, %s1872_s7, %s1874_s5, %s1876_s10  }
  0x2f   : > { %p1538_p3 = pnand %p891_p5, %p389_p1  ;;  %s1543_s20 = sadd.s32 4294967295, %s1369_s14  }
  0x30   : > { %s874_s22 = sadd.s32 4294967294, %s1369_s14   ;;  %s41_s23 = sadd.s32 1, %s1361_s12 }
  0x31   : > { %s57_s1 = sadd.s32 1, %s1349_s9  ;;  %p42_p7 = scmp.ge.s32.totalorder %s41_s23, 3 }
  0x32   : > { %p64_p8 = scmp.ne.s32.totalorder %s1349_s9, %s1345_s8  ;;  %p70_p9 = scmp.ne.s32.totalorder %s1345_s8, %s1341_s30 }
  0x33   : > { %p71_p10 = scmp.eq.s32.totalorder %s1543_s20, 0  ;;  %s1965_s23 = smov (%p42_p7, %s41_s23), 0 }
  0x34   : > { %1907 = sst [smem:[#allocation23_spill]] %s1965_s23  ;;  %s1908_s16 = sadd.s32 1, %s1365_s13 }
  0x35   : > { %s1967_s16 = smov (!%p42_p7, %s1908_s16), %s1365_s13  ;;  %s53_s18 = ssub.s32 %s1361_s12, %s1965_s23 }
  0x36   : > { %p1562_p5 = por %p65_p0, %p64_p8  ;;  %p46_p11 = scmp.ge.s32.totalorder %s1967_s16, 2 }
  0x37   : > { %p55_p12 = scmp.eq.s32.totalorder %s53_s18, 0  ;;  %p1566_p13 = por %p71_p10, %p70_p9 }
  0x38   : > { %p98_p1 = scmp.ne.s32.totalorder %s1333_s28, %s1329_s27  ;;  %s1969_s16 = smov (%p46_p11, %s1967_s16), 0 }
  0x39   : > { %s1910_s30 = scalar_select %p1566_p13, 1, 0 }
  0x3a   : > { %1912 = sst [smem:[#allocation25_spill]] %s1969_s16  ;;  %s80_s10 = ssub.s32 %s1365_s13, %s1969_s16 }
  0x3b   : > { %1911 = sst [smem:[#allocation24_spill]] %s1910_s30  ;;  %p1579_p0 = por %p98_p1, %p71_p10 }
  0x3c   : > { %s1575_s5 = scalar_select %p55_p12, %s1349_s9, %s57_s1  }
  0x3d   : > { %s82_s4 = sor.u32 %s80_s10, %s53_s18  ;;  %p245_p7 = scmp.eq.s32.totalorder %s80_s10, 0 }
  0x3e   : > { %1913 = sst [smem:[#allocation26_spill]] %s1575_s5  ;;  %p83_p8 = scmp.eq.s32.totalorder %s82_s4, 0 }
  0x3f   : > { %s247_s11 = sadd.s32 1, %s1325_s26  ;;  %s1916_s27 = sadd.s32 1, %s1337_s29 }
  0x40   : > { %s1585_s30 = scalar_select %p245_p7, %s1325_s26, %s247_s11  }
  0x41   : > { %s1590_s28 = scalar_select %p83_p8, %s1337_s29, %s1916_s27  }
  0x42   : > { %1915 = sst [smem:[#allocation27_spill]] %s1585_s30  ;;  %p257_p9 = scmp.ne.s32.totalorder %s1325_s26, %s1321_s25 }
  0x43   : > { %1917 = sst [smem:[#allocation28_spill]] %s1590_s28  ;;  %p258_p11 = scmp.eq.s32.totalorder %s1543_s20, 5 }
  0x44   : > { %p263_p12 = scmp.ne.s32.totalorder %s1321_s25, %s1317_s24  ;;  %p264_p6 = scmp.eq.s32.totalorder %s874_s22, 5 }
  0x45   : > { %p1597_p10 = por %p258_p11, %p257_p9  ;;  %s284_s18 = sand.u32 1, %s1349_s9  }
  0x46   : > { %p1602_p1 = por %p264_p6, %p263_p12  ;;  %s877_s10 = sshll.u32 %s284_s18, 3 }
  0x47   : > { %s1918_s1 = scalar_select %p1597_p10, 1, 0 }
  0x48   : > { %s1919_s4 = scalar_select %p1602_p1, 1, 0 }
  0x49   : > { %s878_s11 = sshll.u32 %s1361_s12, 7  ;;  %s1921_s0 = sld [smem:[#allocation30_spill]] }
  0x4a   : > { %1920 = sst [smem:[#allocation29_spill]] %s1919_s4  ;;  %s288_s5 = scalar_lea.vmem [#allocation3], %s877_s10 }
  0x4b   : > { %s297_s28 = sshll.u32 %s288_s5, 4  ;;  %p1614_p7 = pnand %p985_p2, %p1562_p5  ;;  %s298_s28 = int_to_ptr.vmem [resolvable:$true] %s297_s28 }
  0x4c   : > { %s339_s26 = scalar_lea.hbm %s1864_s2, %s1515_s15  ;;  %s285_s4 = scalar_lea.sflag [#allocation4], %s284_s18 }
  0x4d   : > { %p1135_p6 = pneg %p1614_p7  ;;  %s1146_s12 = scalar_lea.vmem %s298_s28, 128 }
  0x4e   : > { %p1147_p8 = scmp.ne.s32.totalorder %s298_s28, %s1146_s12  ;;  %s1375_s13 = smov [#allocation3]  }
  0x4f   : > { %s295_s27 = scalar_lea.hbm %s1921_s0, %s878_s11  ;;  %s1151_s7 = sshll.u32 %s1375_s13, 4  ;;  %s1152_s7 = int_to_ptr.vmem [resolvable:$false] %s1151_s7 }
  0x50   : > { %p1149_p9 = pnand %p1147_p8, %p1135_p6  ;;  %s1153_s5 = scalar_lea.vmem %s1152_s7, 256 }
  0x51   : > { %p1154_p2 = scmp.lt.s32.totalorder %s298_s28, %s1152_s7  ;;  %p1155_p5 = scmp.lt.s32.totalorder %s1153_s5, %s1146_s12 }
  0x52   : > { %p1150_p11 = pneg %p1149_p9 }
  0x53   : > { %p1156_p12 = por %p1155_p5, %p1154_p2 }
  0x55   : > { %p1157_p1 = pnand %p1156_p12, %p1150_p11 }
  0x57   : > { %1160 = shalt.err (!%p1157_p1)
}
  0x58   : > { %971 = dma.hbm_to_vmem [thread:$0]  (!%p1614_p7), %s295_s27, 128, %s298_s28, %s285_s4  }
  0x59   : > { %s331_s9 = scalar_lea.vmem [#allocation8], %s1504_s19  ;;  %p1923_p8 = pneg %p1509_p4 }
  0x5a   : > { %s340_s16 = sshll.u32 %s331_s9, 4  ;;  %s1376_s18 = smov [#allocation8]   ;;  %s341_s16 = int_to_ptr.vmem [resolvable:$true] %s340_s16 }
  0x5b   : > { %s1174_s30 = scalar_lea.vmem %s341_s16, 2048  ;;  %s1179_s10 = sshll.u32 %s1376_s18, 4  ;;  %s1180_s10 = int_to_ptr.vmem [resolvable:$false] %s1179_s10 }
  0x5c   : > { %p1175_p6 = scmp.ne.s32.totalorder %s341_s16, %s1174_s30  ;;  %s1181_s12 = scalar_lea.vmem %s1180_s10, 4096 }
  0x5d   : > { %p1182_p11 = scmp.lt.s32.totalorder %s341_s16, %s1180_s10  ;;  %p1183_p1 = scmp.lt.s32.totalorder %s1181_s12, %s1174_s30 }
  0x5e   : > { %p1177_p9 = pnand %p1175_p6, %p1923_p8 }
  0x5f   : > { %p1184_p2 = por %p1183_p1, %p1182_p11 }
  0x60   : > { %p1178_p10 = pneg %p1177_p9 }
  0x62   : > { %p1185_p5 = pnand %p1184_p2, %p1178_p10 }
  0x64   : > { %1188 = shalt.err (!%p1185_p5)
}
  0x65   : > { %s1924_s28 = smov 8   ;;  %s1925_s4 = smov 128  }
  0x66   : > { %s1926_s11 = smov 384   ;;  %s362_s5 = scalar_lea.hbm %s1865_s3, %s1515_s15 }
  0x67   : > { %977 = dma.hbm_to_vmem [thread:$0]  (!%p1509_p4), %s339_s26, 2048, %s341_s16, %s1522_s6, %s1926_s11, %s1925_s4, %s1924_s28  }
  0x68   : > { %s354_s9 = scalar_lea.vmem [#allocation9], %s1504_s19  ;;  %s1927_s18 = sand.u32 1, %s1337_s29  }
  0x69   : > { %s363_s30 = sshll.u32 %s354_s9, 4  ;;  %s351_s10 = scalar_lea.sflag [#allocation10], %s1927_s18  ;;  %s364_s30 = int_to_ptr.vmem [resolvable:$true] %s363_s30 }
  0x6a   : > { %s1202_s12 = scalar_lea.vmem %s364_s30, 2048  ;;  %p1928_p7 = pmov %p1923_p8 }
  0x6b   : > { %p1203_p10 = scmp.ne.s32.totalorder %s364_s30, %s1202_s12  ;;  %s1377_s27 = smov [#allocation9]  }
  0x6c   : > { %s1207_s22 = sshll.u32 %s1377_s27, 4  ;;  %s1208_s22 = int_to_ptr.vmem [resolvable:$false] %s1207_s22 }
  0x6d   : > { %p1205_p12 = pnand %p1203_p10, %p1928_p7  ;;  %s1209_s0 = scalar_lea.vmem %s1208_s22, 4096 }
  0x6e   : > { %p1210_p8 = scmp.lt.s32.totalorder %s364_s30, %s1208_s22  ;;  %p1211_p9 = scmp.lt.s32.totalorder %s1209_s0, %s1202_s12 }
  0x6f   : > { %p1206_p6 = pneg %p1205_p12 }
  0x70   : > { %p1212_p11 = por %p1211_p9, %p1210_p8 }
  0x72   : > { %p1213_p1 = pnand %p1212_p11, %p1206_p6 }
  0x74   : > { %1216 = shalt.err (!%p1213_p1)
}
  0x75   : > { %980 = dma.hbm_to_vmem [thread:$0]  (!%p1509_p4), %s362_s5, 2048, %s364_s30, %s351_s10, %s1926_s11, %s1925_s4, %s1924_s28  }
  0x76   : > { %393 = sbr.rel (%p1538_p3) target bundleno = 460 (0x1cc), region = 48  ;;  %s395_s26 = sand.u32 (!%p1538_p3), 1, %s1345_s8  }
  0x77   : > { %s1659_s15 = sshll.u32 (!%p1538_p3), %s395_s26, 3  ;;  %s396_s19 = scalar_lea.sflag (!%p1538_p3), [#allocation4], %s395_s26 }
  0x78   : > { %s399_s0 = scalar_lea.vmem (!%p1538_p3), [#allocation3], %s1659_s15 }
  0x7b   : > { %1300 = dma.done.wait (%p1566_p13), %s396_s19, 128  }
  0x7c   : > { %1302 = vsyncadd (%p1566_p13), %s396_s19, 4294967168  ;;  %s1930_s21 = sld [smem:[#allocation17_spill]]  ;;  %s404_s16 = sand.u32 1, %s1543_s20  }
  0x7d   : > { %s405_s4 = scalar_lea.sflag [#allocation7], %s404_s16 }
  0x82   : > { %s406_s28 = sand.u32 1, %s1930_s21  }
  0x83   : > { %s893_s17 = sshll.u32 %s406_s28, 7 }
  0x84   : > { %s1668_s11 = scalar_lea.vmem [#allocation6], %s893_s17 }
  0x85   : > { %1304 = dma.done.wait (%p1579_p0), %s405_s4, 4096  }
  0x86   : > { %1306 = vsyncadd (%p1579_p0), %s405_s4, 4294963200  ;;  %s1674_s13 = scalar_lea.vmem [#allocation8], %s893_s17  ;;  %s423_s7 = scalar_lea.sflag [#allocation10], %s406_s28 }
  0x87   : > { %s1676_s5 = scalar_lea.vmem [#allocation9], %s893_s17 }
  0x88   : > { %1308 = dma.done.wait (%p1579_p0), %s423_s7, 2048  }
  0x89   : > { %1310 = vsyncadd (%p1579_p0), %s423_s7, 4294965248  ;;  %s1931_s20 = sld [smem:[#allocation20_spill]]  ;;  %s478_s9 = sand.u32 1, %s1321_s25  }
  0x8a   : > { %s1686_s30 = sshll.u32 %s478_s9, 3  ;;  %s1932_s12 = sld [smem:[#allocation32_spill]] }
  0x8b   : > { %s1933_s6 = sld [smem:[#allocation33_spill]]  ;;  %s480_s17 = scalar_lea.vmem [#allocation11], %s1686_s30 }
  0x8c   : > { %s1934_s16 = sld [smem:[#allocation34_spill]] }
  0x8d   : > { %s1935_s4 = sld [smem:[#allocation19_spill]] }
  0x8f   : > { %p484_p4 = scmp.lt.s32.totalorder %s1931_s20, 1 }
  0x91   : > { %s1971_s20 = smov (!%p484_p4, %s1931_s20), 1 }
  0x92   : > { %s486_s23 = scalar_lea.vmem %s1932_s12, %s1971_s20  ;;  %s489_s26 = scalar_lea.vmem %s1933_s6, %s1971_s20 }
  0x93   : > { %s492_s28 = scalar_lea.vmem %s1934_s16, %s1971_s20  ;;  %p897_p3 = scmp.ne.s32.totalorder %s1935_s4, 0 }
  0x95   : > { %496 = sbr.rel (%p897_p3) target bundleno = 156 (0x9c), region = 68 }
  0x9a   : > { %v1378_v0 = vmov 0.0  }
  0x9b   : > { %497 = vst [vmem:[#allocation2] sm:$0xff] %v1378_v0 }
  0x9c PF: > { %v513_v1 = vld [vmem:[%s1668_s11 + $0x78] sm:$0xff]  ;;  %v1379_v4 = vmov 0.0   ;;  %v528_v6 = vld [vmem:[%s1674_s13 + $0x70] sm:$0xff]  ;;  %vm1380_vm0 = vmmov 0   ;;  %v527_v10 = vld [vmem:[%s1674_s13 + $0x68] sm:$0xff] }
  0x9d   : > { %v529_v2 = vld [vmem:[%s1674_s13 + $0x78] sm:$0xff]  ;;  %920 = vmatprep.subr.mxu0 %v1379_v4  ;;  %v544_v7 = vld [vmem:[%s1676_s5 + $0x70] sm:$0xff]  ;;  %952 = vmatprep.mubr.msk.f32.mxu0 %vm1380_vm0, %v1379_v4  ;;  %v543_v11 = vld [vmem:[%s1676_s5 + $0x68] sm:$0xff] }
  0x9e   : > { %v545_v3 = vld [vmem:[%s1676_s5 + $0x78] sm:$0xff]  ;;  %v512_v8 = vld [vmem:[%s1668_s11 + $0x70] sm:$0xff]  ;;  %v560_v9 = vmul.f32 %v544_v7, %v528_v6  ;;  %v559_v14 = vmul.f32 %v543_v11, %v527_v10  ;;  %v511_v15 = vld [vmem:[%s1668_s11 + $0x68] sm:$0xff] }
  0x9f   : > { %v561_v5 = vmul.f32 %v545_v3, %v529_v2  ;;  %v526_v16 = vld [vmem:[%s1674_s13 + $0x60] sm:$0xff]  ;;  %v525_v21 = vld [vmem:[%s1674_s13 + $0x58] sm:$0xff]  ;;  %v524_v26 = vld [vmem:[%s1674_s13 + $0x50] sm:$0xff] }
  0xa0   : > { %v576_v13 = vadd.f32 %v560_v9, %v512_v8  ;;  %v542_v17 = vld [vmem:[%s1676_s5 + $0x60] sm:$0xff]  ;;  %v575_v18 = vadd.f32 %v559_v14, %v511_v15  ;;  %v541_v22 = vld [vmem:[%s1676_s5 + $0x58] sm:$0xff]  ;;  %v540_v27 = vld [vmem:[%s1676_s5 + $0x50] sm:$0xff] }
  0xa1   : > { %v577_v12 = vadd.f32 %v561_v5, %v513_v1  ;;  %v558_v19 = vmul.f32 %v542_v17, %v526_v16  ;;  %v510_v20 = vld [vmem:[%s1668_s11 + $0x60] sm:$0xff]  ;;  %v557_v24 = vmul.f32 %v541_v22, %v525_v21  ;;  %v509_v25 = vld [vmem:[%s1668_s11 + $0x58] sm:$0xff]  ;;  %v556_v29 = vmul.f32 %v540_v27, %v524_v26  ;;  %v508_v30 = vld [vmem:[%s1668_s11 + $0x50] sm:$0xff] }
  0xa2   : > { %v523_v31 = vld [vmem:[%s1674_s13 + $0x48] sm:$0xff]  ;;  %v522_v36 = vld [vmem:[%s1674_s13 + $0x40] sm:$0xff]  ;;  %v521_v41 = vld [vmem:[%s1674_s13 + $0x38] sm:$0xff] }
  0xa3   : > { %921 = vmatpush3.xpose.msra.mxu0 %v577_v12  ;;  %v574_v23 = vadd.f32 %v558_v19, %v510_v20  ;;  %v573_v28 = vadd.f32 %v557_v24, %v509_v25  ;;  %v539_v32 = vld [vmem:[%s1676_s5 + $0x48] sm:$0xff]  ;;  %v572_v33 = vadd.f32 %v556_v29, %v508_v30  ;;  %v538_v37 = vld [vmem:[%s1676_s5 + $0x40] sm:$0xff]  ;;  %v537_v42 = vld [vmem:[%s1676_s5 + $0x38] sm:$0xff] }
  0xa4   : > { %922 = vmatprep.subr.mxu0 %v1379_v4  ;;  %v555_v34 = vmul.f32 %v539_v32, %v523_v31  ;;  %v507_v35 = vld [vmem:[%s1668_s11 + $0x48] sm:$0xff]  ;;  %v554_v39 = vmul.f32 %v538_v37, %v522_v36  ;;  %v506_v40 = vld [vmem:[%s1668_s11 + $0x40] sm:$0xff]  ;;  %v553_v44 = vmul.f32 %v537_v42, %v521_v41  ;;  %v505_v45 = vld [vmem:[%s1668_s11 + $0x38] sm:$0xff] }
  0xa5   : > { %v520_v46 = vld [vmem:[%s1674_s13 + $0x30] sm:$0xff]  ;;  %v519_v51 = vld [vmem:[%s1674_s13 + $0x28] sm:$0xff]  ;;  %v518_v56 = vld [vmem:[%s1674_s13 + $0x20] sm:$0xff] }
  0xa6   : > { %v571_v38 = vadd.f32 %v555_v34, %v507_v35  ;;  %v570_v43 = vadd.f32 %v554_v39, %v506_v40  ;;  %v536_v47 = vld [vmem:[%s1676_s5 + $0x30] sm:$0xff]  ;;  %v569_v48 = vadd.f32 %v553_v44, %v505_v45  ;;  %v535_v52 = vld [vmem:[%s1676_s5 + $0x28] sm:$0xff]  ;;  %v534_v57 = vld [vmem:[%s1676_s5 + $0x20] sm:$0xff] }
  0xa7   : > { %923 = vmatpush3.xpose.msra.mxu0 %v576_v13  ;;  %v552_v49 = vmul.f32 %v536_v47, %v520_v46  ;;  %v504_v50 = vld [vmem:[%s1668_s11 + $0x30] sm:$0xff]  ;;  %v551_v54 = vmul.f32 %v535_v52, %v519_v51  ;;  %v503_v55 = vld [vmem:[%s1668_s11 + $0x28] sm:$0xff]  ;;  %v550_v59 = vmul.f32 %v534_v57, %v518_v56  ;;  %v502_v60 = vld [vmem:[%s1668_s11 + $0x20] sm:$0xff] }
  0xa8   : > { %924 = vmatprep.subr.mxu0 %v1379_v4  ;;  %v517_v61 = vld [vmem:[%s1674_s13 + $0x18] sm:$0xff]  ;;  %v516_v2 = vld [vmem:[%s1674_s13 + $0x10] sm:$0xff]  ;;  %v515_v8 = vld [vmem:[%s1674_s13 + $0x8] sm:$0xff] }
  0xa9   : > { %v568_v53 = vadd.f32 %v552_v49, %v504_v50  ;;  %v567_v58 = vadd.f32 %v551_v54, %v503_v55  ;;  %v533_v62 = vld [vmem:[%s1676_s5 + $0x18] sm:$0xff]  ;;  %v566_v63 = vadd.f32 %v550_v59, %v502_v60  ;;  %v532_v3 = vld [vmem:[%s1676_s5 + $0x10] sm:$0xff]  ;;  %v531_v9 = vld [vmem:[%s1676_s5 + $0x8] sm:$0xff] }
  0xaa   : > { %v549_v0 = vmul.f32 %v533_v62, %v517_v61  ;;  %v501_v1 = vld [vmem:[%s1668_s11 + $0x18] sm:$0xff]  ;;  %v548_v6 = vmul.f32 %v532_v3, %v516_v2  ;;  %v500_v7 = vld [vmem:[%s1668_s11 + $0x10] sm:$0xff]  ;;  %v547_v11 = vmul.f32 %v531_v9, %v515_v8  ;;  %v499_v12 = vld [vmem:[%s1668_s11 + $0x8] sm:$0xff] }
  0xab   : > { %925 = vmatpush3.xpose.msra.mxu0 %v575_v18  ;;  %v514_v13 = vld [vmem:[%s1674_s13] sm:$0xff]  ;;  %v579_v19 = vld [vmem:[%s399_s0] sm:$0xff]  ;;  %v578_v20 = vld [vmem:[#allocation2] sm:$0xff]  ;;  %s1936_s13 = sld [smem:[#allocation19_spill]] }
  0xac   : > { %926 = vmatprep.subr.mxu0 %v1379_v4  ;;  %v565_v5 = vadd.f32 %v549_v0, %v501_v1  ;;  %v564_v10 = vadd.f32 %v548_v6, %v500_v7  ;;  %v530_v14 = vld [vmem:[%s1676_s5] sm:$0xff]  ;;  %v563_v15 = vadd.f32 %v547_v11, %v499_v12 }
  0xad   : > { %v546_v16 = vmul.f32 %v530_v14, %v514_v13  ;;  %v498_v17 = vld [vmem:[%s1668_s11] sm:$0xff] }
  0xaf   : > { %927 = vmatpush3.xpose.msra.mxu0 %v574_v23  ;;  %v562_v18 = vadd.f32 %v546_v16, %v498_v17 }
  0xb0   : > { %928 = vmatprep.subr.mxu0 %v1379_v4 }
  0xb1   : > { %p898_p13 = scmp.ne.s32.totalorder %s1936_s13, 2 }
  0xb3   : > { %929 = vmatpush3.xpose.msra.mxu0 %v573_v28 }
  0xb4   : > { %930 = vmatprep.subr.mxu0 %v1379_v4 }
  0xb7   : > { %931 = vmatpush3.xpose.msra.mxu0 %v572_v33 }
  0xb8   : > { %932 = vmatprep.subr.mxu0 %v1379_v4 }
  0xbb   : > { %933 = vmatpush3.xpose.msra.mxu0 %v571_v38 }
  0xbc   : > { %934 = vmatprep.subr.mxu0 %v1379_v4 }
  0xbf   : > { %935 = vmatpush3.xpose.msra.mxu0 %v570_v43 }
  0xc0   : > { %936 = vmatprep.subr.mxu0 %v1379_v4 }
  0xc3   : > { %937 = vmatpush3.xpose.msra.mxu0 %v569_v48 }
  0xc4   : > { %938 = vmatprep.subr.mxu0 %v1379_v4 }
  0xc7   : > { %939 = vmatpush3.xpose.msra.mxu0 %v568_v53 }
  0xc8   : > { %940 = vmatprep.subr.mxu0 %v1379_v4 }
  0xcb   : > { %941 = vmatpush3.xpose.msra.mxu0 %v567_v58 }
  0xcc   : > { %942 = vmatprep.subr.mxu0 %v1379_v4 }
  0xcf   : > { %943 = vmatpush3.xpose.msra.mxu0 %v566_v63 }
  0xd0   : > { %944 = vmatprep.subr.mxu0 %v1379_v4 }
  0xd3   : > { %945 = vmatpush3.xpose.msra.mxu0 %v565_v5 }
  0xd4   : > { %946 = vmatprep.subr.mxu0 %v1379_v4 }
  0xd7   : > { %947 = vmatpush3.xpose.msra.mxu0 %v564_v10 }
  0xd8   : > { %948 = vmatprep.subr.mxu0 %v1379_v4 }
  0xdb   : > { %949 = vmatpush3.xpose.msra.mxu0 %v563_v15 }
  0xdc   : > { %950 = vmatprep.subr.mxu0 %v1379_v4 }
  0xdf   : > { %951 = vmatpush3.xpose.msra.mxu0 %v562_v18 }
  0xe2   : > { %953 = vmatmul.mubr.f32.vlgmr.msra.gmra.mxu0 %v579_v19 }
 0x1a1   : > { %655 = sbr.rel (%p898_p13) target bundleno = 434 (0x1b2), region = 72 }
 0x1a2   : > { %v646_v21 = vpop.f32.mrf.mxu0 }
 0x1a3   : > { %v650_v22 = vadd.f32 %v646_v21, %v578_v20 }
 0x1a4   : > { %v954_v23 = vpop.f32.mrf.mxu0 }
 0x1a5   : > { %651 = vst [vmem:[#allocation2] sm:$0xff] %v650_v22 }
 0x1a6   : > { %v656_v4 = vld [vmem:[%s486_s23] sm:$0x1]  ;;  %v663_v26 = vlaneseq }
 0x1a7   : > { %v657_v24 = vld [vmem:[%s489_s26] sm:$0x1] }
 0x1a8   : > { %v658_v25 = vld [vmem:[%s492_s28] sm:$0x1]  ;;  %v664_v28 = vshrl.u32 %v663_v26, 7 }
 0x1a9   : > { %v659_v27 = vmul.f32 %v658_v25, %v657_v24 }
 0x1aa   : > { %v665_v30 = vsub.s32 0, %v664_v28 }
 0x1ab   : > { %v660_v29 = vadd.f32 %v659_v27, %v656_v4 }
 0x1ac   : > { %v661_v31 = vld [vmem:[#allocation2] sm:$0xff] }
 0x1ad   : > { %v666_v32 = vrot.slane %v660_v29, %v665_v30 }
 0x1af   : > { %v668_v33 = vadd.f32 %v666_v32, %v661_v31 }
 0x1b1   : > { %669 = vst [vmem:[%s480_s17] sm:$0xff] %v668_v33 }
 0x1b2 PF: > { %s1940_s23 = sld [smem:[#allocation20_spill]]  ;;  %s686_s21 = sshll.u32 %s480_s17, 4  ;;  %s687_s21 = int_to_ptr.vmem [resolvable:$true] %s686_s21 }
 0x1b3   : > { %s1941_s20 = sld [smem:[#allocation35_spill]]  ;;  %s671_s16 = scalar_lea.sflag [#allocation5], %s478_s9 }
 0x1b4   : > { %s1217_s28 = scalar_lea.vmem %s687_s21, 128  ;;  %p1942_p2 = scmp.ne.s32.totalorder %s1918_s1, 0 }
 0x1b5   : > { %p1218_p0 = scmp.ne.s32.totalorder %s687_s21, %s1217_s28  ;;  %s1381_s4 = smov [#allocation11]  }
 0x1b6   : > { %s1221_s13 = sshll.u32 %s1381_s4, 4  ;;  %s1222_s13 = int_to_ptr.vmem [resolvable:$false] %s1221_s13 }
 0x1b7   : > { %p1219_p5 = pnand %p1218_p0, %p1942_p2  ;;  %s1223_s7 = scalar_lea.vmem %s1222_s13, 256 }
 0x1b8   : > { %s900_s22 = sshll.u32 %s1940_s23, 7  ;;  %p1224_p7 = scmp.lt.s32.totalorder %s687_s21, %s1222_s13 }
 0x1b9   : > { %s684_s19 = scalar_lea.hbm %s1941_s20, %s900_s22  ;;  %p1220_p10 = pneg %p1219_p5 }
 0x1ba   : > { %p1225_p12 = scmp.lt.s32.totalorder %s1223_s7, %s1217_s28 }
 0x1bc   : > { %p1226_p6 = por %p1225_p12, %p1224_p7 }
 0x1be   : > { %p1227_p8 = pnand %p1226_p6, %p1220_p10 }
 0x1c0   : > { %1230 = shalt.err (!%p1227_p8)
}
 0x1c1   : > { %s1231_s5 = scalar_lea.hbm %s684_s19, 128  ;;  %s1235_s17 = scalar_lea.hbm %s1941_s20, 256 }
 0x1c2   : > { %p1232_p9 = scmp.ne.s32.totalorder %s684_s19, %s1231_s5  ;;  %p1236_p4 = scmp.lt.s32.totalorder %s684_s19, %s1941_s20 }
 0x1c3   : > { %p1237_p3 = scmp.lt.s32.totalorder %s1235_s17, %s1231_s5 }
 0x1c4   : > { %p1233_p11 = pnand %p1232_p9, %p1942_p2 }
 0x1c5   : > { %p1238_p13 = por %p1237_p3, %p1236_p4 }
 0x1c6   : > { %p1234_p1 = pneg %p1233_p11 }
 0x1c8   : > { %p1239_p0 = pnand %p1238_p13, %p1234_p1 }
 0x1ca   : > { %1242 = shalt.err (!%p1239_p0)
}
 0x1cb   : > { %966 = dma.vmem_to_hbm [thread:$0]  (%p1942_p2), %s687_s21, 128, %s684_s19, %s671_s16  }
 0x1cc PF: > { %s1943_s0 = sld [smem:[#allocation29_spill]]  ;;  %p986_p5 = scmp.ge.s32.totalorder %s1369_s14, 2 }
 0x1cd   : > { %s698_s11 = sand.u32 1, %s1317_s24  }
 0x1ce   : > { %s699_s10 = scalar_lea.sflag [#allocation5], %s698_s11 }
 0x1d2   : > { %p1944_p10 = scmp.ne.s32.totalorder %s1943_s0, 0 }
 0x1d4   : > { %p982_p7 = pnand %p986_p5, %p1944_p10 }
 0x1d6   : > { %p983_p12 = pneg %p982_p7 }
 0x1d8   : > { %1312 = dma.done.wait (%p983_p12), %s699_s10, 128  }
 0x1d9   : > { %1314 = vsyncadd (%p983_p12), %s699_s10, 4294967168  ;;  %s29_s14 = sadd.s32 1, %s1369_s14   ;;  %s1946_s1 = sld [smem:[#allocation16_spill]] }
 0x1da   : > { %p1815_p6 = scmp.ge.s32.totalorder %s29_s14, 8   ;;  %s1947_s26 = sld [smem:[#allocation27_spill]] }
 0x1db   : > { %s1948_s27 = sld [smem:[#allocation17_spill]]  ;;  %s1957_s24 = smov %s1321_s25 }
 0x1dc   : > { %s1949_s23 = sld [smem:[#allocation28_spill]]  ;;  %s1959_s28 = smov %s1337_s29 }
 0x1dd   : > { %s1950_s22 = sld [smem:[#allocation18_spill]]  ;;  %s1961_s30 = smov %s1345_s8 }
 0x1de   : > { %s1951_s9 = sld [smem:[#allocation26_spill]] }
 0x1df   : > { %s1952_s10 = sld [smem:[#allocation21_spill]]  ;;  %s1958_s25 = smov %s1946_s1 }
 0x1e0   : > { %s1953_s11 = sld [smem:[#allocation22_spill]] }
 0x1e1   : > { %s1954_s6 = sld [smem:[#allocation23_spill]] }
 0x1e2   : > { %s1955_s13 = sld [smem:[#allocation25_spill]]  ;;  %s1960_s29 = smov %s1949_s23 }
 0x1e3   : > { %s1962_s8 = smov %s1950_s22  ;;  %28 = sbr.rel (!%p1815_p6) target bundleno = 21 (0x15), region = 147 }
 0x1e7   : > { %s1963_s12 = smov %s1954_s6 }
 0x1e8   :  { %704 = vsyncpa [#allocation4], 1 }
 0x1e9   :  { %706 = vsyncpa [#allocation4 + $0x1], 1 }
 0x1ea   :  { %707 = vsyncpa [#allocation7], 1 }
 0x1eb   :  { %709 = vsyncpa [#allocation7 + $0x1], 1 }
 0x1ec   :  { %710 = vsyncpa [#allocation10], 1 }
 0x1ed   :  { %712 = vsyncpa [#allocation10 + $0x1], 1 }
 0x1ee   :  { %713 = vsyncpa [#allocation5], 1 }
 0x1ef   :  { %715 = vsyncpa [#allocation5 + $0x1], 1 }

</bundles_post_ra>
